<compile_context>
chip_gen: v7x
topology: tpu7x:2x2x1
jax: 0.10.0
libtpu: 0.0.40
codegen_flags: <defaults>
</compile_context>

<pallas_src>
import jax
import jax.numpy as jnp
from jax import lax
from jax.experimental import pallas as pl
from jax.experimental.pallas import tpu as pltpu


_VMEM_TILE_BUDGET = 12 << 20   # per-step working-set cap (safe across v5e/v6e/v7x)
_VMEM_LIMIT = 32 << 20         # explicit scoped-VMEM limit handed to Mosaic


def _round_up(x, m):
    return ((x + m - 1) // m) * m


def _loss_from_uv(u, v, lbl, R, T):
    """u, v: (D, TB) f32; lbl: (1, TB) f32 -> (1, TB) f32 loss."""
    diff = u - v
    d_uv = jnp.sum(diff * diff, axis=0, keepdims=True)    # e_dist_2(u, v)
    nu = jnp.sum(u * u, axis=0, keepdims=True)            # e_dist_2(0, u)
    nv = jnp.sum(v * v, axis=0, keepdims=True)            # e_dist_2(0, v)
    # h_dist = arcosh(1 + 2 * d_uv / ((1 - |u|^2) * (1 - |v|^2)))
    ret = 1.0 + 2.0 * d_uv / ((1.0 - nu) * (1.0 - nv))
    # arcosh(x) = log(x + sqrt((x-1)*(x+1))); factored form avoids the cancellation of
    # x*x-1 near x==1, and the clamp keeps sqrt's argument non-negative when u == v.
    dist = jnp.log(ret + jnp.sqrt(jnp.maximum((ret - 1.0) * (ret + 1.0), 0.0)))
    z = (dist - R) / T
    # label==1 -> log(exp(z)+1) = softplus(z); label!=1 -> log(1+1/exp(z)) = softplus(-z)
    x = jnp.where(lbl == 1.0, z, -z)
    return jnp.maximum(x, 0.0) + jnp.log1p(jnp.exp(-jnp.abs(x)))


def _gathered_kernel(rt_ref, u_ref, v_ref, lbl_ref, out_ref):
    # u_ref / v_ref: (D, TB) tiles with the pair axis on lanes.
    R = rt_ref[0]
    T = rt_ref[1]
    u = u_ref[...].astype(jnp.float32)
    v = v_ref[...].astype(jnp.float32)
    out_ref[...] = _loss_from_uv(u, v, lbl_ref[...], R, T).astype(out_ref.dtype)


def _fused_gather_kernel(rt_ref, tab_ref, ui_ref, vi_ref, lbl_ref, out_ref):
    # tab_ref: (D_pad, N_pad) table resident in VMEM; ui/vi: (1, TB) int32 indices.
    R = rt_ref[0]
    T = rt_ref[1]
    tab = tab_ref[...]
    ui = ui_ref[...]
    vi = vi_ref[...]
    n_pad = tab.shape[1]
    tb = ui.shape[1]
    node_ids = lax.broadcasted_iota(jnp.int32, (n_pad, tb), 0)
    u_oh = (node_ids == ui).astype(jnp.float32)            # (N_pad, TB) one-hot
    v_oh = (node_ids == vi).astype(jnp.float32)
    u = jnp.dot(tab, u_oh, preferred_element_type=jnp.float32)   # (D_pad, TB)
    v = jnp.dot(tab, v_oh, preferred_element_type=jnp.float32)
    out_ref[...] = _loss_from_uv(u, v, lbl_ref[...], R, T).astype(out_ref.dtype)


def _pick_tile(B, block_pairs, bytes_per_pair):
    b128 = _round_up(max(B, 1), 128)
    tb = min(_round_up(block_pairs, 128), b128)
    # Keep >= ~4 grid steps for large batches (v7x 2-TC sharding + DMA overlap).
    cap = max(128, (b128 // 4) // 128 * 128)
    tb = min(tb, cap)
    # VMEM working-set budget; halving keeps tb a multiple of 128.
    while tb > 128 and tb * bytes_per_pair > _VMEM_TILE_BUDGET:
        tb = max(128, _round_up(tb // 2, 128))
    return tb


def poincare_loss(table, pairs, labels, *, R, T, block_pairs=8192, fuse_gather=None):
    """Forward of the PyTorch `Poincare` module.

    table: (n_nodes, n_dim) f32; pairs: (B, 2) int32; labels: (B,) int -> (B,) f32.
    """
    B = pairs.shape[0]
    n_nodes, n_dim = table.shape

    rt = jnp.asarray([R, T], dtype=jnp.float32)            # SMEM scalars (no recompile)
    lbl = labels.astype(jnp.float32).reshape(1, B)

    d_pad = _round_up(n_dim, 8)
    n_pad = _round_up(n_nodes, 128)
    if fuse_gather is None:
        fuse_gather = (n_nodes <= 2048) and (d_pad * n_pad * 4 <= (2 << 20))

    compiler_params = pltpu.CompilerParams(
        dimension_semantics=("parallel",), vmem_limit_bytes=_VMEM_LIMIT)

    if fuse_gather:
        # Path A: embedding lookup fused into the kernel via one-hot MXU matmul.
        bytes_per_pair = 8 * n_pad + 8 * d_pad + 64        # one-hots + u/v tiles + idx/lbl/out
        tb = _pick_tile(B, block_pairs, bytes_per_pair)
        b_pad = _round_up(B, tb)
        pad = b_pad - B

        tab_t = jnp.zeros((d_pad, n_pad), jnp.float32).at[:n_dim, :n_nodes].set(
            table.astype(jnp.float32).T)
        ui = jnp.pad(pairs[:, 0].astype(jnp.int32).reshape(1, B), ((0, 0), (0, pad)))
        vi = jnp.pad(pairs[:, 1].astype(jnp.int32).reshape(1, B), ((0, 0), (0, pad)))
        lblp = jnp.pad(lbl, ((0, 0), (0, pad)))

        cost = pl.CostEstimate(
            flops=int(b_pad) * (4 * d_pad * n_pad + 6 * n_dim + 32),
            transcendentals=4 * int(b_pad),
            bytes_accessed=int(b_pad) * 16 + d_pad * n_pad * 4,
        )
        out = pl.pallas_call(
            _fused_gather_kernel,
            out_shape=jax.ShapeDtypeStruct((1, b_pad), jnp.float32),
            grid=(b_pad // tb,),
            in_specs=[
                pl.BlockSpec(memory_space=pltpu.MemorySpace.SMEM),    # [R, T]
                pl.BlockSpec((d_pad, n_pad), lambda i: (0, 0)),       # table (resident)
                pl.BlockSpec((1, tb), lambda i: (0, i)),              # u indices
                pl.BlockSpec((1, tb), lambda i: (0, i)),              # v indices
                pl.BlockSpec((1, tb), lambda i: (0, i)),              # labels
            ],
            out_specs=pl.BlockSpec((1, tb), lambda i: (0, i)),
            compiler_params=compiler_params,
            cost_estimate=cost,
        )(rt, tab_t, ui, vi, lblp)
        return out[0, :B]

    # Path B: large table — gather straight into the (D, B) lane-major layout
    # (transpose the table once; no (B, D) intermediate, no activation transpose).
    bytes_per_pair = 2 * (2 * n_dim * 4 + 3 * 4)           # double-buffered u/v + lbl/out
    tb = _pick_tile(B, block_pairs, bytes_per_pair)
    b_pad = _round_up(B, tb)
    pad = b_pad - B

    table_t = table.astype(jnp.float32).T                  # (D, n_nodes), one-time
    ut = jnp.take(table_t, pairs[:, 0], axis=1)            # (D, B) directly
    vt = jnp.take(table_t, pairs[:, 1], axis=1)
    if pad:
        ut = jnp.pad(ut, ((0, 0), (0, pad)))               # zero cols: ret=1, dist=0 (safe)
        vt = jnp.pad(vt, ((0, 0), (0, pad)))
        lbl = jnp.pad(lbl, ((0, 0), (0, pad)))

    cost = pl.CostEstimate(
        flops=int(b_pad) * (6 * n_dim + 32),
        transcendentals=4 * int(b_pad),
        bytes_accessed=int(b_pad) * 4 * (2 * n_dim + 2),
    )
    out = pl.pallas_call(
        _gathered_kernel,
        out_shape=jax.ShapeDtypeStruct((1, b_pad), jnp.float32),
        grid=(b_pad // tb,),
        in_specs=[
            pl.BlockSpec(memory_space=pltpu.MemorySpace.SMEM),        # [R, T]
            pl.BlockSpec((n_dim, tb), lambda i: (0, i)),
            pl.BlockSpec((n_dim, tb), lambda i: (0, i)),
            pl.BlockSpec((1, tb), lambda i: (0, i)),
        ],
        out_specs=pl.BlockSpec((1, tb), lambda i: (0, i)),
        compiler_params=compiler_params,
        cost_estimate=cost,
    )(rt, ut, vt, lbl)
    return out[0, :B]


def _reference(table, pairs, labels, R, T):
    us = table[pairs[:, 0]]
    vs = table[pairs[:, 1]]
    d_uv = jnp.sum((us - vs) ** 2, axis=1)
    nu = jnp.sum(us ** 2, axis=1)
    nv = jnp.sum(vs ** 2, axis=1)
    ret = 1.0 + 2.0 * d_uv / ((1.0 - nu) * (1.0 - nv))
    dist = jnp.log(ret + jnp.sqrt(jnp.maximum(ret ** 2 - 1.0, 0.0)))
    e = jnp.exp((dist - R) / T)
    lbl = labels.astype(jnp.float32)
    return jnp.where(lbl == 1.0, jnp.log(e + 1.0), jnp.log(1.0 + 1.0 / e))


if __name__ == "__main__":
    # Module hyper-params (synthetic, deterministic init -- no checkpoint load).
    n_nodes, n_dim = 32, 32
    R, T = 5.0, 1.0
    init_range = 0.001

    key = jax.random.PRNGKey(0)
    k_tbl, k_pairs, k_lbl = jax.random.split(key, 3)

    # nn.Embedding(n_nodes, n_dim) with uniform_(-init_range, init_range)
    table = jax.random.uniform(
        k_tbl, (n_nodes, n_dim), jnp.float32, minval=-init_range, maxval=init_range
    )

    for B in (8, 300):   # B=300 exercises padding + a multi-step grid
        kp = jax.random.fold_in(k_pairs, B)
        kl = jax.random.fold_in(k_lbl, B)
        pairs = jax.random.randint(kp, (B, 2), 0, n_nodes, dtype=jnp.int32)
        labels = jax.random.randint(kl, (B,), 0, 2, dtype=jnp.int32)
        ref = _reference(table, pairs, labels, R, T)

        # Path A: in-kernel (fused) embedding lookup, table resident in VMEM.
        loss_fused = poincare_loss(table, pairs, labels, R=R, T=T, fuse_gather=True)
        jax.block_until_ready(loss_fused)
        # Path B: XLA gather into (D, B) layout + batched distance/loss kernel.
        loss_gather = poincare_loss(table, pairs, labels, R=R, T=T, fuse_gather=False)
        jax.block_until_ready(loss_gather)

        for loss in (loss_fused, loss_gather):
            assert loss.shape == (B,)
            assert jnp.allclose(loss, ref, atol=1e-5, rtol=1e-5), (B, loss, ref)

    print("KERNEL_OK")
</pallas_src>

<mosaic_0001>
module attributes {stable_mosaic.version = 11 : i64} {
  func.func @_fused_gather_kernel(%arg0: i32, %arg1: memref<2xf32, #tpu.memory_space<smem>>, %arg2: memref<32x128xf32, #tpu.memory_space<vmem>>, %arg3: memref<1x128xi32, #tpu.memory_space<vmem>>, %arg4: memref<1x128xi32, #tpu.memory_space<vmem>>, %arg5: memref<1x128xf32, #tpu.memory_space<vmem>>, %arg6: memref<1x128xf32, #tpu.memory_space<vmem>>) attributes {dimension_semantics = [#tpu.dimension_semantics<parallel>], iteration_bounds = array<i64: 1>, scalar_prefetch = 0 : i64, scratch_operands = 0 : i64, tpu.core_type = #tpu.core_type<tc>, window_params = [{transform_indices = @transform_0, window_bounds = array<i64: 2>}, {pipeline_mode = #tpu.pipeline_mode<synchronous>, transform_indices = @transform_1, window_bounds = array<i64: 32, 128>}, {transform_indices = @transform_2, window_bounds = array<i64: 1, 128>}, {transform_indices = @transform_3, window_bounds = array<i64: 1, 128>}, {transform_indices = @transform_4, window_bounds = array<i64: 1, 128>}, {transform_indices = @transform_5, window_bounds = array<i64: 1, 128>}]} {
    %c0 = arith.constant 0 : index
    %0 = memref.load %arg1[%c0] : memref<2xf32, #tpu.memory_space<smem>>
    %c1 = arith.constant 1 : index
    %1 = memref.load %arg1[%c1] : memref<2xf32, #tpu.memory_space<smem>>
    %c0_0 = arith.constant 0 : index
    %c0_1 = arith.constant 0 : index
    %2 = vector.load %arg2[%c0_0, %c0_1] : memref<32x128xf32, #tpu.memory_space<vmem>>, vector<32x128xf32>
    %c0_2 = arith.constant 0 : index
    %c0_3 = arith.constant 0 : index
    %3 = vector.load %arg3[%c0_2, %c0_3] : memref<1x128xi32, #tpu.memory_space<vmem>>, vector<1x128xi32>
    %c0_4 = arith.constant 0 : index
    %c0_5 = arith.constant 0 : index
    %4 = vector.load %arg4[%c0_4, %c0_5] : memref<1x128xi32, #tpu.memory_space<vmem>>, vector<1x128xi32>
    %5 = tpu.iota {dimensions = array<i32: 0>} : vector<128x128xi32>
    %6 = vector.broadcast %3 : vector<1x128xi32> to vector<128x128xi32>
    %7 = arith.cmpi eq, %5, %6 : vector<128x128xi32>
    %8 = arith.extui %7 : vector<128x128xi1> to vector<128x128xi32>
    %9 = arith.sitofp %8 : vector<128x128xi32> to vector<128x128xf32>
    %10 = vector.broadcast %4 : vector<1x128xi32> to vector<128x128xi32>
    %11 = arith.cmpi eq, %5, %10 : vector<128x128xi32>
    %12 = arith.extui %11 : vector<128x128xi1> to vector<128x128xi32>
    %13 = arith.sitofp %12 : vector<128x128xi32> to vector<128x128xf32>
    %cst = arith.constant dense<0.000000e+00> : vector<32x128xf32>
    %14 = tpu.matmul %2, %9, %cst {dimension_numbers = #tpu.dot_dimension_numbers<[1], [0], [0], [1], [0, 0, 1, 1], [], []>} : vector<32x128xf32>, vector<128x128xf32>, vector<32x128xf32> -> vector<32x128xf32>
    %cst_6 = arith.constant dense<0.000000e+00> : vector<32x128xf32>
    %15 = tpu.matmul %2, %13, %cst_6 {dimension_numbers = #tpu.dot_dimension_numbers<[1], [0], [0], [1], [0, 0, 1, 1], [], []>} : vector<32x128xf32>, vector<128x128xf32>, vector<32x128xf32> -> vector<32x128xf32>
    %c0_7 = arith.constant 0 : index
    %c0_8 = arith.constant 0 : index
    %16 = vector.load %arg5[%c0_7, %c0_8] : memref<1x128xf32, #tpu.memory_space<vmem>>, vector<1x128xf32>
    %17 = arith.subf %14, %15 : vector<32x128xf32>
    %18 = arith.mulf %17, %17 : vector<32x128xf32>
    %cst_9 = arith.constant dense<0.000000e+00> : vector<128xf32>
    %19 = vector.multi_reduction <add>, %18, %cst_9 [0] : vector<32x128xf32> to vector<128xf32>
    %20 = vector.shape_cast %19 : vector<128xf32> to vector<1x128xf32>
    %21 = arith.mulf %14, %14 : vector<32x128xf32>
    %cst_10 = arith.constant dense<0.000000e+00> : vector<128xf32>
    %22 = vector.multi_reduction <add>, %21, %cst_10 [0] : vector<32x128xf32> to vector<128xf32>
    %23 = vector.shape_cast %22 : vector<128xf32> to vector<1x128xf32>
    %24 = arith.mulf %15, %15 : vector<32x128xf32>
    %cst_11 = arith.constant dense<0.000000e+00> : vector<128xf32>
    %25 = vector.multi_reduction <add>, %24, %cst_11 [0] : vector<32x128xf32> to vector<128xf32>
    %26 = vector.shape_cast %25 : vector<128xf32> to vector<1x128xf32>
    %cst_12 = arith.constant 2.000000e+00 : f32
    %27 = vector.broadcast %cst_12 : f32 to vector<1x128xf32>
    %28 = arith.mulf %27, %20 : vector<1x128xf32>
    %cst_13 = arith.constant 1.000000e+00 : f32
    %29 = vector.broadcast %cst_13 : f32 to vector<1x128xf32>
    %30 = arith.subf %29, %23 : vector<1x128xf32>
    %cst_14 = arith.constant 1.000000e+00 : f32
    %31 = vector.broadcast %cst_14 : f32 to vector<1x128xf32>
    %32 = arith.subf %31, %26 : vector<1x128xf32>
    %33 = arith.mulf %30, %32 : vector<1x128xf32>
    %34 = arith.divf %28, %33 : vector<1x128xf32>
    %cst_15 = arith.constant 1.000000e+00 : f32
    %35 = vector.broadcast %cst_15 : f32 to vector<1x128xf32>
    %36 = arith.addf %35, %34 : vector<1x128xf32>
    %cst_16 = arith.constant 1.000000e+00 : f32
    %37 = vector.broadcast %cst_16 : f32 to vector<1x128xf32>
    %38 = arith.subf %36, %37 : vector<1x128xf32>
    %cst_17 = arith.constant 1.000000e+00 : f32
    %39 = vector.broadcast %cst_17 : f32 to vector<1x128xf32>
    %40 = arith.addf %36, %39 : vector<1x128xf32>
    %41 = arith.mulf %38, %40 : vector<1x128xf32>
    %cst_18 = arith.constant 0.000000e+00 : f32
    %42 = vector.broadcast %cst_18 : f32 to vector<1x128xf32>
    %43 = arith.maximumf %41, %42 : vector<1x128xf32>
    %44 = math.sqrt %43 : vector<1x128xf32>
    %45 = arith.addf %36, %44 : vector<1x128xf32>
    %46 = math.log %45 : vector<1x128xf32>
    %47 = vector.broadcast %0 : f32 to vector<1x128xf32>
    %48 = arith.subf %46, %47 : vector<1x128xf32>
    %49 = vector.broadcast %1 : f32 to vector<1x128xf32>
    %50 = arith.divf %48, %49 : vector<1x128xf32>
    %cst_19 = arith.constant 1.000000e+00 : f32
    %51 = vector.broadcast %cst_19 : f32 to vector<1x128xf32>
    %52 = arith.cmpf oeq, %16, %51 : vector<1x128xf32>
    %cst_20 = arith.constant 0.000000e+00 : f32
    %53 = vector.broadcast %cst_20 : f32 to vector<1x128xf32>
    %54 = arith.subf %53, %50 : vector<1x128xf32>
    %55 = arith.select %52, %50, %54 : vector<1x128xi1>, vector<1x128xf32>
    %cst_21 = arith.constant 0.000000e+00 : f32
    %56 = vector.broadcast %cst_21 : f32 to vector<1x128xf32>
    %57 = arith.maximumf %55, %56 : vector<1x128xf32>
    %58 = math.absf %55 : vector<1x128xf32>
    %cst_22 = arith.constant 0.000000e+00 : f32
    %59 = vector.broadcast %cst_22 : f32 to vector<1x128xf32>
    %60 = arith.subf %59, %58 : vector<1x128xf32>
    %61 = math.exp %60 : vector<1x128xf32>
    %62 = math.log1p %61 : vector<1x128xf32>
    %63 = arith.addf %57, %62 : vector<1x128xf32>
    %c0_23 = arith.constant 0 : index
    %c0_24 = arith.constant 0 : index
    %64 = vector.load %arg6[%c0_23, %c0_24] : memref<1x128xf32, #tpu.memory_space<vmem>>, vector<1x128xf32>
    tpu.vector_store %arg6[%c0_23, %c0_24], %63 {strides = array<i32>} : memref<1x128xf32, #tpu.memory_space<vmem>>, vector<1x128xf32>,
    return
  }
  func.func @transform_0(%arg0: i32) -> i32 {
    %c0_i32 = arith.constant 0 : i32
    %c0_i32_0 = arith.constant 0 : i32
    return %c0_i32 : i32
  }
  func.func @transform_1(%arg0: i32) -> (i32, i32) {
    %c0_i32 = arith.constant 0 : i32
    %c0_i32_0 = arith.constant 0 : i32
    %c0_i32_1 = arith.constant 0 : i32
    return %c0_i32, %c0_i32_0 : i32, i32
  }
  func.func @transform_2(%arg0: i32) -> (i32, i32) {
    %c0_i32 = arith.constant 0 : i32
    %c0_i32_0 = arith.constant 0 : i32
    return %c0_i32, %arg0 : i32, i32
  }
  func.func @transform_3(%arg0: i32) -> (i32, i32) {
    %c0_i32 = arith.constant 0 : i32
    %c0_i32_0 = arith.constant 0 : i32
    return %c0_i32, %arg0 : i32, i32
  }
  func.func @transform_4(%arg0: i32) -> (i32, i32) {
    %c0_i32 = arith.constant 0 : i32
    %c0_i32_0 = arith.constant 0 : i32
    return %c0_i32, %arg0 : i32, i32
  }
  func.func @transform_5(%arg0: i32) -> (i32, i32) {
    %c0_i32 = arith.constant 0 : i32
    %c0_i32_0 = arith.constant 0 : i32
    return %c0_i32, %arg0 : i32, i32
  }
}

</mosaic_0001>

<bundles_post_ra>
// kernel: tpu_custom_call.1
= control target key start
LH: loop header
LB: loop body
LE: loop exit
PB: predicated region body
PF: predicated region fallthrough
CT: control target
= control target key end

     0   :  { %10 = vsyncpa [#allocation5], 0  ;;  %s1012_s0 = inlined_call_operand.hbm [shape: f32[2], index: 0, kind: input, shape index: {}]   ;;  %s1013_s1 = inlined_call_operand.hbm [shape: f32[32,128], index: 1, kind: input, shape index: {}]   ;;  %s1014_s2 = inlined_call_operand.vmem [shape: s32[1,128], index: 2, kind: input, shape index: {}]   ;;  %s1015_s3 = inlined_call_operand.vmem [shape: s32[1,128], index: 3, kind: input, shape index: {}]   ;;  %s1016_s4 = inlined_call_operand.vmem [shape: f32[1,128], index: 4, kind: input, shape index: {}]   ;;  %s1017_s5 = inlined_call_operand.hbm [shape: f32[1,128], index: 5, kind: output, shape index: {}]  }
   0x1   :  { %11 = vsyncpa [#allocation3], 0 }
   0x2   :  { %12 = vsyncpa [#allocation4], 0  ;;  %s716_s20 = scalar_lea.hbm %s1012_s0, 16 }
   0x3   :  { %p717_p0 = scmp.ne.s32.totalorder %s1012_s0, %s716_s20  ;;  %p720_p1 = scmp.lt.u32.totalorder %s716_s20, %s1012_s0 }
   0x5   :  { %p722_p2 = pnand %p720_p1, %p717_p0 }
   0x7   :  { %725 = shalt.err (!%p722_p2)
}
   0x8   :  { %s776_s25 = smov [#allocation2]   ;;  %s777_s28 = smov [#allocation6]  }
   0x9   :  { %20 = dma.hbm_to_smem %s1012_s0, 16, %s776_s25, [#allocation5]  }
   0xa   :  { %s26_s29 = sshll.u32 %s777_s28, 4  ;;  %s726_s7 = scalar_lea.hbm %s1013_s1, 512  ;;  %s27_s29 = int_to_ptr.vmem [resolvable:$true] %s26_s29 }
   0xb   :  { %p727_p3 = scmp.ne.s32.totalorder %s1013_s1, %s726_s7  ;;  %p730_p4 = scmp.lt.u32.totalorder %s726_s7, %s1013_s1 }
   0xd   :  { %p732_p5 = pnand %p730_p4, %p727_p3 }
   0xf   :  { %735 = shalt.err (!%p732_p5)
}
  0x10   :  { %s736_s12 = scalar_lea.vmem %s27_s29, 512  ;;  %p741_p7 = scmp.lt.s32.totalorder %s27_s29, %s27_s29 }
  0x11   :  { %p737_p6 = scmp.ne.s32.totalorder %s27_s29, %s736_s12  ;;  %p742_p8 = scmp.lt.s32.totalorder %s736_s12, %s736_s12 }
  0x13   :  { %p743_p9 = por %p742_p8, %p741_p7 }
  0x15   :  { %p744_p10 = pnand %p743_p9, %p737_p6 }
  0x17   :  { %747 = shalt.err (!%p744_p10)
}
  0x18   :  { %s778_s0 = smov 128   ;;  %s779_s13 = smov 8  }
  0x19   :  { %32 = dma.hbm_to_vmem [thread:$0]  %s1013_s1, 512, %s27_s29, [#allocation3], %s778_s0, %s778_s0, %s779_s13  }
  0x1a   :  { %770 = dma.done.wait [#allocation5], 16  }
  0x1b   :  { %771 = vsyncadd [#allocation5], 4294967280 }
  0x1c   :  { %772 = dma.done.wait [#allocation3], 512  }
  0x1d   :  { %773 = vsyncadd [#allocation3], 4294966784 }
  0x1e   :  { %45 = sfence }
  0x1f   :  { %v54_v0 = vlaneseq  ;;  %v839_v1 = vld [vmem:[%s1014_s2] ss:$0 sm:$0xff]  ;;  %v780_v10 = vmov 1.0|1.0   ;;  %v49_v29 = vld [vmem:[#allocation6 + $0x8] sm:$0xff]  ;;  %v50_v30 = vld [vmem:[#allocation6 + $0x10] sm:$0xff] }
  0x20   :  { %v48_v2 = vld [vmem:[#allocation6] sm:$0xff]  ;;  %v51_v31 = vld [vmem:[#allocation6 + $0x18] sm:$0xff]  ;;  %s450_s1 = sld [smem:[#allocation2 + $0x1]]  ;;  %s46_s2 = sld [smem:[#allocation2]] }
  0x21   :  { %v841_v3 = vshrl.u32 %v54_v0, 7  ;;  %v846_v4 = vld [vmem:[%s1015_s3] ss:$0 sm:$0xff]  ;;  %590 = vmatprep.mubr.f32.mxu0 %v48_v2  ;;  %628 = vmatprep.mubr.f32.mxu1 %v48_v2  ;;  %s781_s21 = smov [#allocation7]  }
  0x23   :  { %v56_v5 = vadd.s32 8, %v841_v3  ;;  %vm75_vm0 = vcmp.eq.s32.totalorder %v841_v3, %v839_v1  ;;  %v57_v6 = vadd.s32 16, %v841_v3  ;;  %vm127_vm1 = vcmp.eq.s32.totalorder %v841_v3, %v846_v4 }
  0x24   :  { %v58_v7 = vadd.s32 24, %v841_v3  ;;  %v59_v8 = vadd.s32 32, %v841_v3  ;;  %v60_v9 = vadd.s32 40, %v841_v3  ;;  %v61_v11 = vadd.s32 48, %v841_v3 }
  0x25   :  { %vm76_vm2 = vcmp.eq.s32.totalorder %v56_v5, %v839_v1  ;;  %vm128_vm3 = vcmp.eq.s32.totalorder %v56_v5, %v846_v4  ;;  %vm77_vm4 = vcmp.eq.s32.totalorder %v57_v6, %v839_v1  ;;  %vm129_vm7 = vcmp.eq.s32.totalorder %v57_v6, %v846_v4 }
  0x26   :  { %vm634_vm5 = vmpackc.low %vm76_vm2, %vm75_vm0  ;;  %vm78_vm6 = vcmp.eq.s32.totalorder %v58_v7, %v839_v1  ;;  %vm130_vm8 = vcmp.eq.s32.totalorder %v58_v7, %v846_v4  ;;  %vm79_vm10 = vcmp.eq.s32.totalorder %v59_v8, %v839_v1  ;;  %vm80_vm11 = vcmp.eq.s32.totalorder %v60_v9, %v839_v1 }
  0x27   :  { %635 = vmatprep.subr.msk.bf16.mxu0 %vm634_vm5, %v780_v10  ;;  %vm666_vm9 = vmpackc.low %vm128_vm3, %vm127_vm1  ;;  %v62_v12 = vadd.s32 56, %v841_v3  ;;  %vm131_vm13 = vcmp.eq.s32.totalorder %v59_v8, %v846_v4  ;;  %vm132_vm14 = vcmp.eq.s32.totalorder %v60_v9, %v846_v4  ;;  %vm81_vm2 = vcmp.eq.s32.totalorder %v61_v11, %v839_v1 }
  0x28   :  { %667 = vmatprep.subr.msk.bf16.mxu1 %vm666_vm9, %v780_v10  ;;  %637 = vmatpush3.bf16.msk.msra.mxu0 %vm634_vm5, %v780_v10  ;;  %vm638_vm12 = vmpackc.low %vm78_vm6, %vm77_vm4  ;;  %v63_v15 = vadd.s32 64, %v841_v3  ;;  %v64_v16 = vadd.s32 72, %v841_v3  ;;  %vm133_vm4 = vcmp.eq.s32.totalorder %v61_v11, %v846_v4  ;;  %v65_v19 = vadd.s32 80, %v841_v3 }
  0x29   :  { %669 = vmatpush3.bf16.msk.msra.mxu1 %vm666_vm9, %v780_v10  ;;  %639 = vmatprep.subr.msk.bf16.mxu0 %vm638_vm12, %v780_v10  ;;  %vm670_vm15 = vmpackc.low %vm130_vm8, %vm129_vm7  ;;  %vm82_vm3 = vcmp.eq.s32.totalorder %v62_v12, %v839_v1  ;;  %vm134_vm5 = vcmp.eq.s32.totalorder %v62_v12, %v846_v4  ;;  %v66_v20 = vadd.s32 88, %v841_v3  ;;  %v67_v23 = vadd.s32 96, %v841_v3 }
  0x2a   :  { %671 = vmatprep.subr.msk.bf16.mxu1 %vm670_vm15, %v780_v10  ;;  %vm879_vm0 = vmpackc.low %vm80_vm11, %vm79_vm10  ;;  %vm83_vm8 = vcmp.eq.s32.totalorder %v63_v15, %v839_v1  ;;  %vm84_vm9 = vcmp.eq.s32.totalorder %v64_v16, %v839_v1  ;;  %vm135_vm10 = vcmp.eq.s32.totalorder %v63_v15, %v846_v4  ;;  %vm136_vm11 = vcmp.eq.s32.totalorder %v64_v16, %v846_v4 }
  0x2b   :  { %vm883_vm1 = vmpackc.low %vm132_vm14, %vm131_vm13  ;;  %vm85_vm14 = vcmp.eq.s32.totalorder %v65_v19, %v839_v1  ;;  %v68_v24 = vadd.s32 104, %v841_v3  ;;  %v69_v27 = vadd.s32 112, %v841_v3  ;;  %v70_v28 = vadd.s32 120, %v841_v3 }
  0x2c   :  { %641 = vmatpush3.bf16.msk.msra.mxu0 %vm638_vm12, %v780_v10  ;;  %vm901_vm6 = vmpackc.low %vm82_vm3, %vm81_vm2 }
  0x2d   :  { %673 = vmatpush3.bf16.msk.msra.mxu1 %vm670_vm15, %v780_v10  ;;  %643 = vmatprep.subr.msk.bf16.mxu0 %vm879_vm0, %v780_v10  ;;  %vm905_vm7 = vmpackc.low %vm134_vm5, %vm133_vm4  ;;  %vm86_vm15 = vcmp.eq.s32.totalorder %v66_v20, %v839_v1  ;;  %vm87_vm4 = vcmp.eq.s32.totalorder %v67_v23, %v839_v1  ;;  %vm88_vm5 = vcmp.eq.s32.totalorder %v68_v24, %v839_v1 }
  0x2e   :  { %675 = vmatprep.subr.msk.bf16.mxu1 %vm883_vm1, %v780_v10  ;;  %vm927_vm12 = vmpackc.low %vm84_vm9, %vm83_vm8 }
  0x2f   :  { %vm931_vm13 = vmpackc.low %vm136_vm11, %vm135_vm10  ;;  %vm89_vm10 = vcmp.eq.s32.totalorder %v69_v27, %v839_v1  ;;  %vm90_vm11 = vcmp.eq.s32.totalorder %v70_v28, %v839_v1 }
  0x30   :  { %645 = vmatpush3.bf16.msk.msra.mxu0 %vm879_vm0, %v780_v10  ;;  %vm137_vm0 = vcmp.eq.s32.totalorder %v65_v19, %v846_v4  ;;  %vm953_vm2 = vmpackc.low %vm86_vm15, %vm85_vm14 }
  0x31   :  { %677 = vmatpush3.bf16.msk.msra.mxu1 %vm883_vm1, %v780_v10  ;;  %647 = vmatprep.subr.msk.bf16.mxu0 %vm901_vm6, %v780_v10  ;;  %vm138_vm1 = vcmp.eq.s32.totalorder %v66_v20, %v846_v4  ;;  %vm658_vm8 = vmpackc.low %vm88_vm5, %vm87_vm4 }
  0x32   :  { %679 = vmatprep.subr.msk.bf16.mxu1 %vm905_vm7, %v780_v10  ;;  %vm957_vm3 = vmpackc.low %vm138_vm1, %vm137_vm0 }
  0x33   :  { %vm662_vm14 = vmpackc.low %vm90_vm11, %vm89_vm10 }
  0x34   :  { %649 = vmatpush3.bf16.msk.msra.mxu0 %vm901_vm6, %v780_v10  ;;  %vm139_vm6 = vcmp.eq.s32.totalorder %v67_v23, %v846_v4 }
  0x35   :  { %681 = vmatpush3.bf16.msk.msra.mxu1 %vm905_vm7, %v780_v10  ;;  %651 = vmatprep.subr.msk.bf16.mxu0 %vm927_vm12, %v780_v10  ;;  %vm140_vm7 = vcmp.eq.s32.totalorder %v68_v24, %v846_v4 }
  0x36   :  { %683 = vmatprep.subr.msk.bf16.mxu1 %vm931_vm13, %v780_v10  ;;  %vm690_vm9 = vmpackc.low %vm140_vm7, %vm139_vm6 }
  0x38   :  { %653 = vmatpush3.bf16.msk.msra.mxu0 %vm927_vm12, %v780_v10  ;;  %vm141_vm12 = vcmp.eq.s32.totalorder %v69_v27, %v846_v4 }
  0x39   :  { %685 = vmatpush3.bf16.msk.msra.mxu1 %vm931_vm13, %v780_v10  ;;  %655 = vmatprep.subr.msk.bf16.mxu0 %vm953_vm2, %v780_v10  ;;  %vm142_vm13 = vcmp.eq.s32.totalorder %v70_v28, %v846_v4 }
  0x3a   :  { %687 = vmatprep.subr.msk.bf16.mxu1 %vm957_vm3, %v780_v10  ;;  %vm694_vm15 = vmpackc.low %vm142_vm13, %vm141_vm12 }
  0x3c   :  { %657 = vmatpush3.bf16.msk.msra.mxu0 %vm953_vm2, %v780_v10 }
  0x3d   :  { %689 = vmatpush3.bf16.msk.msra.mxu1 %vm957_vm3, %v780_v10  ;;  %659 = vmatprep.subr.msk.bf16.mxu0 %vm658_vm8, %v780_v10 }
  0x3e   :  { %691 = vmatprep.subr.msk.bf16.mxu1 %vm690_vm9, %v780_v10 }
  0x40   :  { %661 = vmatpush3.bf16.msk.msra.mxu0 %vm658_vm8, %v780_v10 }
  0x41   :  { %693 = vmatpush3.bf16.msk.msra.mxu1 %vm690_vm9, %v780_v10  ;;  %663 = vmatprep.subr.msk.bf16.mxu0 %vm662_vm14, %v780_v10 }
  0x42   :  { %695 = vmatprep.subr.msk.bf16.mxu1 %vm694_vm15, %v780_v10 }
  0x44   :  { %665 = vmatpush3.bf16.msk.msra.mxu0 %vm662_vm14, %v780_v10 }
  0x45   :  { %697 = vmatpush3.bf16.msk.msra.mxu1 %vm694_vm15, %v780_v10 }
  0x47   :  { %591 = vmatmul.mubr.f32.vlgmr.msra.gmra.mrb[0].mxu0 %v49_v29 }
  0x48   :  { %629 = vmatmul.mubr.f32.vlgmr.msra.gmra.mrb[0].mxu1 %v49_v29  ;;  %593 = vmatprep.mubr.f32.mxu0 %v50_v30 }
  0x49   :  { %631 = vmatprep.mubr.f32.mxu1 %v50_v30 }
  0x4b   :  { %594 = vmatmul.mubr.f32.gmra.mrb[2].mxu0 %v51_v31 }
  0x4c   :  { %632 = vmatmul.mubr.f32.gmra.mrb[2].mxu1 %v51_v31 }
 0x11a   :  { %v592_v32 = vpop.f32.mrb[0].mxu0 }
 0x11b   :  { %v364_v33 = vmul.f32 %v592_v32, %v592_v32  ;;  %v630_v34 = vpop.f32.mrb[0].mxu1  ;;  %v241_v35 = vpop.f32.mrb[1].mxu0 }
 0x11c   :  { %v347_v36 = vsub.f32 %v592_v32, %v630_v34  ;;  %v377_v37 = vmul.f32 %v630_v34, %v630_v34  ;;  %v363_v38 = vmul.f32 %v241_v35, %v241_v35  ;;  %v326_v39 = vpop.f32.mrb[1].mxu1 }
 0x11d   :  { %v346_v40 = vsub.f32 %v241_v35, %v326_v39  ;;  %v376_v41 = vmul.f32 %v326_v39, %v326_v39 }
 0x11e   :  { %v351_v42 = vmul.f32 %v347_v36, %v347_v36  ;;  %v367_v43 = vadd.f32 %v364_v33, %v363_v38  ;;  %v595_v44 = vpop.f32.mrb[2].mxu0  ;;  %v412_v36 = vstv %s450_s1  ;;  %v410_v38 = vstv %s46_s2 }
 0x11f   :  { %v350_v45 = vmul.f32 %v346_v40, %v346_v40  ;;  %v380_v46 = vadd.f32 %v377_v37, %v376_v41  ;;  %v633_v47 = vpop.f32.mrb[2].mxu1  ;;  %v251_v48 = vpop.f32.mrb[3].mxu0  ;;  %v366_v55 = vmul.f32 %v595_v44, %v595_v44  ;;  %v345_v41 = vld [vmem:[%s1016_s4] sm:$0x1]  ;;  %s440_s4 = sshll.u32 %s781_s21, 4  ;;  %s441_s4 = int_to_ptr.vmem [resolvable:$true] %s440_s4 }
 0x120   :  { %v349_v49 = vsub.f32 %v595_v44, %v633_v47  ;;  %v365_v50 = vmul.f32 %v251_v48, %v251_v48  ;;  %v336_v51 = vpop.f32.mrb[3].mxu1  ;;  %v379_v57 = vmul.f32 %v633_v47, %v633_v47  ;;  %vm415_vm2 = vcmp.eq.f32.partialorder %v345_v41, 1.0  ;;  %s748_s22 = scalar_lea.vmem %s441_s4, 16  ;;  %s752_s23 = scalar_lea.vmem %s441_s4, 32 }
 0x121   :  { %v354_v52 = vadd.f32 %v351_v42, %v350_v45  ;;  %v348_v53 = vsub.f32 %v251_v48, %v336_v51  ;;  %v378_v54 = vmul.f32 %v336_v51, %v336_v51  ;;  %p749_p11 = scmp.ne.s32.totalorder %s441_s4, %s748_s22  ;;  %p753_p12 = scmp.lt.s32.totalorder %s441_s4, %s441_s4 }
 0x122   :  { %v368_v56 = vadd.f32 %v367_v43, %v365_v50  ;;  %v353_v61 = vmul.f32 %v349_v49, %v349_v49  ;;  %p754_p13 = scmp.lt.s32.totalorder %s752_s23, %s748_s22 }
 0x123   :  { %v352_v58 = vmul.f32 %v348_v53, %v348_v53  ;;  %v381_v59 = vadd.f32 %v380_v46, %v378_v54 }
 0x124   :  { %v369_v60 = vadd.f32 %v368_v56, %v366_v55  ;;  %p755_p0 = por %p754_p13, %p753_p12 }
 0x125   :  { %v355_v62 = vadd.f32 %v354_v52, %v352_v58  ;;  %v382_v63 = vadd.f32 %v381_v59, %v379_v57 }
 0x126   :  { %v370_v0 = vrot.slane %v369_v60, 4  ;;  %p756_p1 = pnand %p755_p0, %p749_p11 }
 0x127   :  { %v356_v1 = vadd.f32 %v355_v62, %v353_v61  ;;  %v383_v2 = vrot.slane %v382_v63, 4 }
 0x128   :  { %v371_v3 = vadd.f32 %v370_v0, %v369_v60 }
 0x129   :  { %v357_v4 = vrot.slane %v356_v1, 4  ;;  %v384_v5 = vadd.f32 %v383_v2, %v382_v63 }
 0x12a   :  { %v372_v6 = vrot.slane %v371_v3, 2 }
 0x12b   :  { %v385_v7 = vrot.slane %v384_v5, 2  ;;  %v358_v9 = vadd.f32 %v357_v4, %v356_v1 }
 0x12c   :  { %v373_v8 = vadd.f32 %v372_v6, %v371_v3 }
 0x12d   :  { %v386_v10 = vadd.f32 %v385_v7, %v384_v5  ;;  %v359_v14 = vrot.slane %v358_v9, 2 }
 0x12e   :  { %v374_v11 = vrot.slane %v373_v8, 1 }
 0x12f   :  { %v387_v12 = vrot.slane %v386_v10, 1  ;;  %v360_v18 = vadd.f32 %v359_v14, %v358_v9 }
 0x130   :  { %v375_v13 = vadd.f32 %v374_v11, %v373_v8 }
 0x131   :  { %v388_v15 = vadd.f32 %v387_v12, %v386_v10  ;;  %v361_v20 = vrot.slane %v360_v18, 1 }
 0x132   :  { %v390_v16 = vsub.f32 1.0, %v375_v13 }
 0x133   :  { %v391_v17 = vsub.f32 1.0, %v388_v15  ;;  %v362_v21 = vadd.f32 %v361_v20, %v360_v18 }
 0x135   :  { %v392_v19 = vmul.f32 %v391_v17, %v390_v16  ;;  %v389_v22 = vmul.f32 2.0, %v362_v21 }
 0x137   :  { %704 = vrcp.f32 %v392_v19 }
 0x141   :  { %v705_v23 = vpop.eup %704 }
 0x142   :  { %v394_v24 = vmul.f32 %v705_v23, %v389_v22 }
 0x144   :  { %v395_v25 = vadd.f32 1.0, %v394_v24 }
 0x146   :  { %v517_v26 = vadd.f32 -1.0, %v395_v25  ;;  %v397_v27 = vadd.f32 1.0, %v395_v25 }
 0x148   :  { %v398_v28 = vmul.f32 %v517_v26, %v397_v27 }
 0x14a   :  { %v399_v29 = vmax.f32 %v398_v28, 0.0 }
 0x14c   :  { %706 = vrsqrt.f32 %v399_v29  ;;  %vm402_vm0 = vcmp.eq.f32.partialorder %v399_v29, inf  ;;  %v405_v32 = vand.u32 2147483648, %v399_v29  ;;  %vm404_vm1 = vcmp.eq.f32.partialorder %v399_v29, 0.0 }
 0x156   :  { %v707_v30 = vpop.eup %706 }
 0x157   :  { %v401_v31 = vmul.f32 %v707_v30, %v399_v29 }
 0x159   :  { %v403_v33 = vsel %vm402_vm0, %v399_v29, %v401_v31 }
 0x15a   :  { %v406_v34 = vsel %vm404_vm1, %v405_v32, %v403_v33 }
 0x15b   :  { %v407_v35 = vadd.f32 %v406_v34, %v395_v25 }
 0x15d   :  { %708 = vlog2.f32 %v407_v35 }
 0x15e   :  { %710 = vrcp.f32 %v412_v36 }
 0x167   :  { %v709_v37 = vpop.eup %708 }
 0x168   :  { %v409_v39 = vmul.f32 0.6931472, %v709_v37  ;;  %v711_v40 = vpop.eup %710 }
 0x16a   :  { %v411_v42 = vsub.f32 %v409_v39, %v410_v38 }
 0x16c   :  { %v414_v43 = vmul.f32 %v711_v40, %v411_v42 }
 0x16e   :  { %v416_v44 = vsub.f32 0.0, %v414_v43 }
 0x170   :  { %v417_v45 = vsel %vm415_vm2, %v414_v43, %v416_v44 }
 0x171   :  { %v419_v46 = vand.u32 2147483647, %v417_v45  ;;  %v418_v57 = vmax.f32 %v417_v45, 0.0 }
 0x173   :  { %v420_v47 = vsub.f32 0.0, %v419_v46 }
 0x175   :  { %v421_v48 = vmul.f32 1.442695, %v420_v47 }
 0x177   :  { %712 = vpow2.f32 %v421_v48 }
 0x181   :  { %v713_v49 = vpop.eup %712 }
 0x182   :  { %v423_v50 = vadd.f32 1.0, %v713_v49  ;;  %v426_v51 = vmul.f32 -0.5, %v713_v49  ;;  %v429_v53 = vand.u32 2147483647, %v713_v49 }
 0x184   :  { %714 = vlog2.f32 %v423_v50  ;;  %v427_v52 = vadd.f32 1.0, %v426_v51  ;;  %vm430_vm3 = vcmp.lt.f32.partialorder %v429_v53, 0.0004427343 }
 0x186   :  { %v428_v56 = vmul.f32 %v713_v49, %v427_v52 }
 0x18e   :  { %v715_v54 = vpop.eup %714 }
 0x18f   :  { %v425_v55 = vmul.f32 0.6931472, %v715_v54 }
 0x191   :  { %v431_v58 = vsel %vm430_vm3, %v428_v56, %v425_v55 }
 0x192   :  { %v432_v59 = vadd.f32 %v431_v58, %v418_v57 }
 0x194   :  { %433 = vst [vmem:[#allocation7] sm:$0x1] %v432_v59 }
 0x195   :  { %759 = shalt.err (!%p756_p1)
}
 0x196   :  { %s760_s26 = scalar_lea.hbm %s1017_s5, 16 }
 0x197   :  { %p761_p2 = scmp.ne.s32.totalorder %s1017_s5, %s760_s26  ;;  %p764_p3 = scmp.lt.u32.totalorder %s760_s26, %s1017_s5 }
 0x199   :  { %p766_p4 = pnand %p764_p3, %p761_p2 }
 0x19b   :  { %769 = shalt.err (!%p766_p4)
}
 0x19c   :  { %443 = dma.vmem_to_hbm [thread:$0]  %s441_s4, 16, %s1017_s5, [#allocation4]  }
 0x19d   :  { %774 = dma.done.wait [#allocation4], 16  }
 0x19e   :  { %775 = vsyncadd [#allocation4], 4294967280 }
 0x19f   :  { %447 = vsyncpa [#allocation3], 1 }
 0x1a0   :  { %448 = vsyncpa [#allocation4], 1 }
 0x1a1   :  { %449 = vsyncpa [#allocation5], 1 }

</bundles_post_ra>
